<compile_context>
chip_gen: v7x
topology: tpu7x:2x2x1
jax: 0.10.0
libtpu: 0.0.40
codegen_flags: <defaults>
</compile_context>

<pallas_src>
import functools
from enum import IntEnum
from collections import defaultdict

import jax
import jax.numpy as jnp
from jax.experimental import pallas as pl
from jax.experimental.pallas import tpu as pltpu


# ----------------------------------------------------------------------------
# Enums / lightweight batch container (stand-ins for the thrift/py deps)
# ----------------------------------------------------------------------------
class EntityType:
    SEARCH_QUERY = 1
    ITEM = 2
    _VALUES_TO_NAMES = {1: "SEARCH_QUERY", 2: "ITEM"}
    _NAMES_TO_VALUES = {v: k for k, v in _VALUES_TO_NAMES.items()}


class TowerState(IntEnum):
    LEARNED = 0
    FIXED_GS = 1
    FIXED_MS = 2
    FIXED_IS = 3


class SageBatch:
    def __init__(self, entity_types, tensor_feats, num_pairs,
                 query_entity_type, candidate_entity_type):
        self.entity_types = entity_types
        self.tensor_feats = tensor_feats
        self.num_pairs = num_pairs
        self.query_entity_type = query_entity_type
        self.candidate_entity_type = candidate_entity_type
        self.search_query_feats = tensor_feats.get(EntityType.SEARCH_QUERY, {})


def _round_up(x, m):
    return (x + m - 1) // m * m


# ----------------------------------------------------------------------------
# Pallas kernel 1: embedder tower  (x @ W1 + b1 -> relu -> @ W2 + b2 -> L2 norm)
#   Row-tiled grid; weights have constant block index -> stay VMEM resident.
# ----------------------------------------------------------------------------
def _embedder_kernel(x_ref, w1_ref, b1_ref, w2_ref, b2_ref, o_ref):
    h = jnp.dot(x_ref[...], w1_ref[...], preferred_element_type=jnp.float32)
    h = jnp.maximum(h + b1_ref[...], 0.0)
    e = jnp.dot(h.astype(jnp.bfloat16), w2_ref[...],
                preferred_element_type=jnp.float32) + b2_ref[...]
    inv = jax.lax.rsqrt(jnp.sum(e * e, axis=-1, keepdims=True) + 1e-12)
    o_ref[...] = (e * inv).astype(o_ref.dtype)


def embedder_forward(x, params, *, tm_max=256):
    w1, b1, w2, b2 = params
    r, f = x.shape
    h, e = w1.shape[1], w2.shape[1]
    tm = min(_round_up(r, 8), tm_max)
    r_pad = _round_up(r, tm)
    xb = jnp.zeros((r_pad, f), jnp.bfloat16).at[:r].set(x.astype(jnp.bfloat16))

    out = pl.pallas_call(
        _embedder_kernel,
        out_shape=jax.ShapeDtypeStruct((r_pad, e), jnp.float32),
        grid=(r_pad // tm,),
        in_specs=[
            pl.BlockSpec((tm, f), lambda i: (i, 0)),   # activation rows (tiled)
            pl.BlockSpec((f, h), lambda i: (0, 0)),    # weights stay resident
            pl.BlockSpec((1, h), lambda i: (0, 0)),
            pl.BlockSpec((h, e), lambda i: (0, 0)),
            pl.BlockSpec((1, e), lambda i: (0, 0)),
        ],
        out_specs=pl.BlockSpec((tm, e), lambda i: (i, 0)),
        compiler_params=pltpu.CompilerParams(
            dimension_semantics=("parallel",),
            vmem_limit_bytes=32 * 1024 * 1024),
    )(xb, w1.astype(jnp.bfloat16), b1.astype(jnp.float32),
      w2.astype(jnp.bfloat16), b2.astype(jnp.float32))
    return out[:r]


# ----------------------------------------------------------------------------
# Pallas kernel 2: multi-dim (matryoshka) sampled-softmax loss
#   q     [B, D]   bf16 query embeddings (tiled over rows, "parallel")
#   candT [D, C]   bf16 candidates, transposed (tiled over cols, "arbitrary")
#   pos   [B, D]   bf16 positives (cand[:B])
#   pid   [B, 1]   int32 positive ids
#   cid   [1, C]   int32 candidate ids
#   out   [B, ND]  per-query CE loss at each matryoshka prefix dim
# Online (flash) log-sum-exp across candidate tiles; additive duplicate-id
# false-negative mask and padded-column mask are built in-kernel.
# ----------------------------------------------------------------------------
def _multidim_softmax_kernel(q_ref, candT_ref, pos_ref, pid_ref, cid_ref,
                             out_ref, m_sc, l_sc, pl_sc, *, dims, c_actual):
    NEG_INF = -1e9
    bi = pl.program_id(0)
    ci = pl.program_id(1)
    nc = pl.num_programs(1)
    tb = q_ref.shape[0]
    tc = candT_ref.shape[1]

    q = q_ref[...]                 # [tb, D] bf16
    cT = candT_ref[...]            # [D, tc] bf16

    # --- init per row-tile (first candidate tile): running max/sum + pos logit
    @pl.when(ci == 0)
    def _init():
        m_sc[...] = jnp.full_like(m_sc, -jnp.inf)
        l_sc[...] = jnp.zeros_like(l_sc)
        p = pos_ref[...]
        start = 0
        acc = None
        for di, dend in enumerate(dims):      # static unrolled prefix segments
            seg = jnp.sum(q[:, start:dend].astype(jnp.float32) *
                          p[:, start:dend].astype(jnp.float32),
                          axis=-1, keepdims=True)
            acc = seg if acc is None else acc + seg
            pl_sc[:, di:di + 1] = acc
            start = dend

    # --- additive mask from ids (no [B,C] HBM mask materialization) ---------
    row_ids = pid_ref[...]                                         # [tb, 1]
    col_ids = cid_ref[...]                                         # [1, tc]
    same = col_ids == row_ids                                      # [tb, tc]
    grow = bi * tb + jax.lax.broadcasted_iota(jnp.int32, (tb, tc), 0)
    gcol = ci * tc + jax.lax.broadcasted_iota(jnp.int32, (tb, tc), 1)
    own = grow == gcol                          # a query's own positive column
    invalid = gcol >= c_actual                  # padded candidate columns
    addmask = jnp.where((same & jnp.logical_not(own)) | invalid,
                        NEG_INF, 0.0).astype(jnp.float32)

    # --- segmented prefix logits + online log-sum-exp over candidate tiles ---
    start = 0
    cum = None
    for di, dend in enumerate(dims):
        part = jnp.dot(q[:, start:dend], cT[start:dend, :],
                       preferred_element_type=jnp.float32)          # [tb, tc]
        cum = part if cum is None else cum + part                   # prefix acc
        logits = cum + addmask                                      # f32 mask
        tile_max = jnp.max(logits, axis=-1, keepdims=True)          # [tb, 1]
        m_prev = m_sc[:, di:di + 1]
        m_new = jnp.maximum(m_prev, tile_max)
        l_sc[:, di:di + 1] = (l_sc[:, di:di + 1] * jnp.exp(m_prev - m_new) +
                              jnp.sum(jnp.exp(logits - m_new),
                                      axis=-1, keepdims=True))
        m_sc[:, di:di + 1] = m_new
        start = dend

    # --- finalize: loss = logsumexp - positive logit (lane-dense single store)
    @pl.when(ci == nc - 1)
    def _fin():
        out_ref[...] = m_sc[...] + jnp.log(l_sc[...]) - pl_sc[...]


def multidim_softmax_losses(query, candT, pos, pos_ids, cand_ids, dims,
                            *, tb_max=256, tc_max=512):
    bsz, d = query.shape
    c = candT.shape[1]
    nd = len(dims)
    assert tuple(dims) == tuple(sorted(dims)) and dims[-1] == d, (dims, d)

    tb = min(_round_up(bsz, 8), tb_max)
    b_pad = _round_up(bsz, tb)
    tc = min(_round_up(c, 128), tc_max)
    c_pad = _round_up(c, tc)

    qb = jnp.zeros((b_pad, d), jnp.bfloat16).at[:bsz].set(query.astype(jnp.bfloat16))
    pb = jnp.zeros((b_pad, d), jnp.bfloat16).at[:bsz].set(pos.astype(jnp.bfloat16))
    cTb = jnp.zeros((d, c_pad), jnp.bfloat16).at[:, :c].set(candT.astype(jnp.bfloat16))
    pid = jnp.full((b_pad, 1), -1, jnp.int32).at[:bsz, 0].set(pos_ids.astype(jnp.int32))
    cid = jnp.full((1, c_pad), -2, jnp.int32).at[0, :c].set(cand_ids.astype(jnp.int32))

    kernel = functools.partial(_multidim_softmax_kernel,
                               dims=tuple(dims), c_actual=c)
    out = pl.pallas_call(
        kernel,
        out_shape=jax.ShapeDtypeStruct((b_pad, nd), jnp.float32),
        grid=(b_pad // tb, c_pad // tc),         # rows parallel, cands reduce
        in_specs=[
            pl.BlockSpec((tb, d), lambda bi, ci: (bi, 0)),   # query rows
            pl.BlockSpec((d, tc), lambda bi, ci: (0, ci)),   # candT columns
            pl.BlockSpec((tb, d), lambda bi, ci: (bi, 0)),   # positives
            pl.BlockSpec((tb, 1), lambda bi, ci: (bi, 0)),   # positive ids
            pl.BlockSpec((1, tc), lambda bi, ci: (0, ci)),   # candidate ids
        ],
        out_specs=pl.BlockSpec((tb, nd), lambda bi, ci: (bi, 0)),
        scratch_shapes=[pltpu.VMEM((tb, nd), jnp.float32),   # running max
                        pltpu.VMEM((tb, nd), jnp.float32),   # running sum
                        pltpu.VMEM((tb, nd), jnp.float32)],  # positive logit
        compiler_params=pltpu.CompilerParams(
            dimension_semantics=("parallel", "arbitrary"),
            vmem_limit_bytes=32 * 1024 * 1024),
    )(qb, cTb, pb, pid, cid)
    return out[:bsz]


class MultiDimSoftmaxCorrectionLossV2:
    """Matryoshka sampled-softmax with duplicate-id false-negative masking."""

    def __init__(self, emb_dim_weights, return_dict=True, **_):
        self.emb_dim_weights = dict(emb_dim_weights)
        self.return_dict = return_dict
        self.dims = tuple(sorted(self.emb_dim_weights))

    def __call__(self, query, query_ids, pos, rnd_neg, pos_ids, neg_ids):
        # TODO(synk): count-min-sketch logQ correction (w=2**26, d=2),
        # synchronize_pos cross-device positive all-gather and query_ids-based
        # masking have no clean single-kernel Pallas equivalent and are omitted.
        del query_ids
        cand = jnp.concatenate([pos, rnd_neg], axis=0)            # [C, D]
        cand_ids = jnp.concatenate([pos_ids, neg_ids], axis=0)    # [C]
        candT = jnp.transpose(cand)                               # [D, C] once
        per_query = multidim_softmax_losses(
            query, candT, pos, pos_ids, cand_ids, self.dims)      # [B, ND]
        per_dim_mean = jnp.mean(per_query, axis=0)                # [ND]
        out = {dd: self.emb_dim_weights[dd] * per_dim_mean[k]
               for k, dd in enumerate(self.dims)}
        return out if self.return_dict else sum(out.values())


# ----------------------------------------------------------------------------
# OmniSearchSAGE (JAX version of the PyTorch module's forward)
# ----------------------------------------------------------------------------
TOTAL_LOSS = "total_loss"
LOSS_COMPONENTS = "loss_components"


class OmniSearchSAGE:
    def __init__(self, embedders):
        # embedders: {(entity_type, tower_state): (w1, b1, w2, b2)}
        self.entity_type_to_tower_states = {}
        for entity_type, tower_state in embedders:
            self.entity_type_to_tower_states.setdefault(entity_type, []).append(
                tower_state)
        self.embedders = {
            self.encode_embedder_key(k[0], k[1]): v for k, v in embedders.items()
        }
        self.similarity_loss = MultiDimSoftmaxCorrectionLossV2(
            synchronize_pos=True, w=2 ** 26, d=2,
            emb_dim_weights=dict([(x, 0.05) for x in (16, 32, 64, 128)]
                                 + [(256, 1.0), (512, 1.0)]),
            return_dict=True)

    @staticmethod
    def encode_embedder_key(entity_type, tower_state):
        return f"{EntityType._VALUES_TO_NAMES[entity_type]}::{tower_state.name}"

    def _forward(self, batch, entity_type, tower_state):
        feats = batch.tensor_feats[entity_type]
        params = self.embedders[self.encode_embedder_key(entity_type, tower_state)]
        return embedder_forward(feats["feat"], params)

    def compute_embeddings(self, batch):
        embeddings = {}
        for entity_type in batch.entity_types:
            if entity_type not in self.entity_type_to_tower_states:
                continue
            for tower_state in self.entity_type_to_tower_states[entity_type]:
                embeddings[entity_type, tower_state] = self._forward(
                    batch, entity_type, tower_state)
        return embeddings

    def extract_query_embs(self, feats, embeddings):
        batch_size = feats.num_pairs
        query_emb = embeddings.pop((EntityType.SEARCH_QUERY, TowerState.LEARNED))
        assert query_emb.shape[0] >= batch_size
        cand_start_index = 0
        if feats.candidate_entity_type == EntityType.SEARCH_QUERY:
            cand_start_index = batch_size
            embeddings[EntityType.SEARCH_QUERY, TowerState.LEARNED] = \
                query_emb[batch_size:]
            query_emb = query_emb[:batch_size]
        return {"query_emb": query_emb, "cand_start_index": cand_start_index,
                "batch_size": batch_size}

    def forward(self, all_feats):
        all_query_features = defaultdict(list)
        all_pos_features = defaultdict(list)
        all_neg_features = defaultdict(list)
        all_pos_ids = defaultdict(list)
        all_neg_ids = defaultdict(list)
        all_query_ids = defaultdict(list)
        for feats in all_feats:
            if not feats.entity_types:
                continue
            embeddings = self.compute_embeddings(feats)
            assert feats.query_entity_type == EntityType.SEARCH_QUERY
            query_features = self.extract_query_embs(feats, embeddings)
            batch_size = query_features["batch_size"]
            query_ids = feats.search_query_feats["id_hash"][:batch_size]
            for (entity_type, tower_state), candidate_embs in embeddings.items():
                key = (feats.query_entity_type, entity_type, tower_state)
                cand_ids = feats.tensor_feats[entity_type]["id_hash"][
                    query_features["cand_start_index"]:]
                all_pos_features[key].append(candidate_embs[:batch_size])
                all_neg_features[key].append(candidate_embs[batch_size:])
                all_pos_ids[key].append(cand_ids[:batch_size])
                all_neg_ids[key].append(cand_ids[batch_size:])
                all_query_features[key].append(query_features["query_emb"])
                all_query_ids[key].append(query_ids)

        losses = {}
        for key in sorted(all_query_features):
            loss = self.similarity_loss(
                query=jnp.concatenate(all_query_features[key], axis=0),
                query_ids=jnp.concatenate(all_query_ids[key], axis=0),
                pos=jnp.concatenate(all_pos_features[key], axis=0),
                rnd_neg=jnp.concatenate(all_neg_features[key], axis=0),
                pos_ids=jnp.concatenate(all_pos_ids[key], axis=0),
                neg_ids=jnp.concatenate(all_neg_ids[key], axis=0))
            q_et, c_et, tower_state = key
            loss_key = (f"{EntityType._VALUES_TO_NAMES[q_et].lower()}_"
                        f"{EntityType._VALUES_TO_NAMES[c_et].lower()}_"
                        f"{tower_state.name.lower()}")
            for wt, loss_w in loss.items():
                losses[f"{loss_key}_{wt}"] = loss_w
        assert len(all_query_features) > 0, "No valid batches"
        return {TOTAL_LOSS: sum(losses.values()) / len(all_query_features),
                LOSS_COMPONENTS: losses}


# ----------------------------------------------------------------------------
# Deterministic parameter init + example run
# ----------------------------------------------------------------------------
def _init_tower(key, feat_dim, hidden_dim, emb_dim):
    k1, k2 = jax.random.split(key)
    w1 = jax.random.normal(k1, (feat_dim, hidden_dim), jnp.float32) * 0.05
    b1 = jnp.zeros((1, hidden_dim), jnp.float32)
    w2 = jax.random.normal(k2, (hidden_dim, emb_dim), jnp.float32) * 0.05
    b2 = jnp.zeros((1, emb_dim), jnp.float32)
    return (w1, b1, w2, b2)


if __name__ == "__main__":
    key = jax.random.PRNGKey(0)
    # EMB must be 512 (matryoshka dims go up to 512); other dims kept small but
    # lane-aligned (>=128) so the MXU path is exercised properly.
    B, N_NEG, FEAT, HIDDEN, EMB = 16, 240, 128, 256, 512

    k_q, k_i, k_fq, k_fi = jax.random.split(key, 4)
    embedders = {
        (EntityType.SEARCH_QUERY, TowerState.LEARNED): _init_tower(k_q, FEAT, HIDDEN, EMB),
        (EntityType.ITEM, TowerState.LEARNED): _init_tower(k_i, FEAT, HIDDEN, EMB),
    }
    model = OmniSearchSAGE(embedders)

    query_feats = {
        "feat": jax.random.normal(k_fq, (B, FEAT), jnp.float32),
        "id_hash": jnp.arange(100, 100 + B, dtype=jnp.int32),
    }
    item_ids = jnp.arange(200, 200 + B + N_NEG, dtype=jnp.int32)
    item_ids = item_ids.at[B].set(200)   # inject a duplicate-id false negative
    item_feats = {
        "feat": jax.random.normal(k_fi, (B + N_NEG, FEAT), jnp.float32),
        "id_hash": item_ids,
    }
    batch = SageBatch(
        entity_types=[EntityType.SEARCH_QUERY, EntityType.ITEM],
        tensor_feats={EntityType.SEARCH_QUERY: query_feats,
                      EntityType.ITEM: item_feats},
        num_pairs=B,
        query_entity_type=EntityType.SEARCH_QUERY,
        candidate_entity_type=EntityType.ITEM,
    )

    out = model.forward([batch])
    total = jax.block_until_ready(out[TOTAL_LOSS])
    for v in out[LOSS_COMPONENTS].values():
        jax.block_until_ready(v)
    assert bool(jnp.isfinite(total)), total
    print("KERNEL_OK")
</pallas_src>

<mosaic_0001>
module attributes {stable_mosaic.version = 11 : i64} {
  func.func @_embedder_kernel(%arg0: i32, %arg1: memref<16x128xbf16, #tpu.memory_space<vmem>>, %arg2: memref<128x256xbf16, #tpu.memory_space<vmem>>, %arg3: memref<1x256xf32, #tpu.memory_space<vmem>>, %arg4: memref<256x512xbf16, #tpu.memory_space<vmem>>, %arg5: memref<1x512xf32, #tpu.memory_space<vmem>>, %arg6: memref<16x512xf32, #tpu.memory_space<vmem>>) attributes {dimension_semantics = [#tpu.dimension_semantics<parallel>], iteration_bounds = array<i64: 1>, scalar_prefetch = 0 : i64, scratch_operands = 0 : i64, tpu.core_type = #tpu.core_type<tc>, window_params = [{transform_indices = @transform_0, window_bounds = array<i64: 16, 128>}, {pipeline_mode = #tpu.pipeline_mode<synchronous>, transform_indices = @transform_1, window_bounds = array<i64: 128, 256>}, {pipeline_mode = #tpu.pipeline_mode<synchronous>, transform_indices = @transform_2, window_bounds = array<i64: 1, 256>}, {pipeline_mode = #tpu.pipeline_mode<synchronous>, transform_indices = @transform_3, window_bounds = array<i64: 256, 512>}, {pipeline_mode = #tpu.pipeline_mode<synchronous>, transform_indices = @transform_4, window_bounds = array<i64: 1, 512>}, {transform_indices = @transform_5, window_bounds = array<i64: 16, 512>}]} {
    %c0 = arith.constant 0 : index
    %c0_0 = arith.constant 0 : index
    %0 = vector.load %arg1[%c0, %c0_0] : memref<16x128xbf16, #tpu.memory_space<vmem>>, vector<16x128xbf16>
    %c0_1 = arith.constant 0 : index
    %c0_2 = arith.constant 0 : index
    %1 = vector.load %arg2[%c0_1, %c0_2] : memref<128x256xbf16, #tpu.memory_space<vmem>>, vector<128x256xbf16>
    %cst = arith.constant dense<0.000000e+00> : vector<16x256xf32>
    %2 = tpu.matmul %0, %1, %cst {dimension_numbers = #tpu.dot_dimension_numbers<[1], [0], [0], [1], [0, 0, 1, 1], [], []>} : vector<16x128xbf16>, vector<128x256xbf16>, vector<16x256xf32> -> vector<16x256xf32>
    %c0_3 = arith.constant 0 : index
    %c0_4 = arith.constant 0 : index
    %3 = vector.load %arg3[%c0_3, %c0_4] : memref<1x256xf32, #tpu.memory_space<vmem>>, vector<1x256xf32>
    %4 = vector.broadcast %3 : vector<1x256xf32> to vector<16x256xf32>
    %5 = arith.addf %2, %4 : vector<16x256xf32>
    %cst_5 = arith.constant 0.000000e+00 : f32
    %6 = vector.broadcast %cst_5 : f32 to vector<16x256xf32>
    %7 = arith.maximumf %5, %6 : vector<16x256xf32>
    %8 = arith.truncf %7 : vector<16x256xf32> to vector<16x256xbf16>
    %c0_6 = arith.constant 0 : index
    %c0_7 = arith.constant 0 : index
    %9 = vector.load %arg4[%c0_6, %c0_7] : memref<256x512xbf16, #tpu.memory_space<vmem>>, vector<256x512xbf16>
    %cst_8 = arith.constant dense<0.000000e+00> : vector<16x512xf32>
    %10 = tpu.matmul %8, %9, %cst_8 {dimension_numbers = #tpu.dot_dimension_numbers<[1], [0], [0], [1], [0, 0, 1, 1], [], []>} : vector<16x256xbf16>, vector<256x512xbf16>, vector<16x512xf32> -> vector<16x512xf32>
    %c0_9 = arith.constant 0 : index
    %c0_10 = arith.constant 0 : index
    %11 = vector.load %arg5[%c0_9, %c0_10] : memref<1x512xf32, #tpu.memory_space<vmem>>, vector<1x512xf32>
    %12 = vector.broadcast %11 : vector<1x512xf32> to vector<16x512xf32>
    %13 = arith.addf %10, %12 : vector<16x512xf32>
    %14 = arith.mulf %13, %13 : vector<16x512xf32>
    %cst_11 = arith.constant dense<0.000000e+00> : vector<16xf32>
    %15 = vector.multi_reduction <add>, %14, %cst_11 [1] : vector<16x512xf32> to vector<16xf32>
    %16 = vector.shape_cast %15 : vector<16xf32> to vector<16x1xf32>
    %cst_12 = arith.constant 9.99999996E-13 : f32
    %17 = vector.broadcast %cst_12 : f32 to vector<16x1xf32>
    %18 = arith.addf %16, %17 : vector<16x1xf32>
    %19 = math.rsqrt %18 : vector<16x1xf32>
    %20 = vector.broadcast %19 : vector<16x1xf32> to vector<16x512xf32>
    %21 = arith.mulf %13, %20 : vector<16x512xf32>
    %c0_13 = arith.constant 0 : index
    %c0_14 = arith.constant 0 : index
    %22 = vector.load %arg6[%c0_13, %c0_14] : memref<16x512xf32, #tpu.memory_space<vmem>>, vector<16x512xf32>
    tpu.vector_store %arg6[%c0_13, %c0_14], %21 {strides = array<i32>} : memref<16x512xf32, #tpu.memory_space<vmem>>, vector<16x512xf32>,
    return
  }
  func.func @transform_0(%arg0: i32) -> (i32, i32) {
    %c0_i32 = arith.constant 0 : i32
    %c0_i32_0 = arith.constant 0 : i32
    return %arg0, %c0_i32 : i32, i32
  }
  func.func @transform_1(%arg0: i32) -> (i32, i32) {
    %c0_i32 = arith.constant 0 : i32
    %c0_i32_0 = arith.constant 0 : i32
    %c0_i32_1 = arith.constant 0 : i32
    return %c0_i32, %c0_i32_0 : i32, i32
  }
  func.func @transform_2(%arg0: i32) -> (i32, i32) {
    %c0_i32 = arith.constant 0 : i32
    %c0_i32_0 = arith.constant 0 : i32
    %c0_i32_1 = arith.constant 0 : i32
    return %c0_i32, %c0_i32_0 : i32, i32
  }
  func.func @transform_3(%arg0: i32) -> (i32, i32) {
    %c0_i32 = arith.constant 0 : i32
    %c0_i32_0 = arith.constant 0 : i32
    %c0_i32_1 = arith.constant 0 : i32
    return %c0_i32, %c0_i32_0 : i32, i32
  }
  func.func @transform_4(%arg0: i32) -> (i32, i32) {
    %c0_i32 = arith.constant 0 : i32
    %c0_i32_0 = arith.constant 0 : i32
    %c0_i32_1 = arith.constant 0 : i32
    return %c0_i32, %c0_i32_0 : i32, i32
  }
  func.func @transform_5(%arg0: i32) -> (i32, i32) {
    %c0_i32 = arith.constant 0 : i32
    %c0_i32_0 = arith.constant 0 : i32
    return %arg0, %c0_i32 : i32, i32
  }
}

</mosaic_0001>

<bundles_post_ra>
// kernel: tpu_custom_call.1
= control target key start
LH: loop header
LB: loop body
LE: loop exit
PB: predicated region body
PF: predicated region fallthrough
CT: control target
= control target key end

     0   :  { %10 = vsyncpa [#allocation3], 0  ;;  %s1186_s0 = inlined_call_operand.hbm [shape: bf16[16,128], index: 0, kind: input, shape index: {}]   ;;  %s1187_s1 = inlined_call_operand.hbm [shape: bf16[128,256], index: 1, kind: input, shape index: {}]   ;;  %s1188_s2 = inlined_call_operand.vmem [shape: f32[1,256], index: 2, kind: input, shape index: {}]   ;;  %s1189_s3 = inlined_call_operand.hbm [shape: bf16[256,512], index: 3, kind: input, shape index: {}]   ;;  %s1190_s4 = inlined_call_operand.vmem [shape: f32[1,512], index: 4, kind: input, shape index: {}]   ;;  %s1191_s5 = inlined_call_operand.hbm [shape: f32[16,512], index: 5, kind: output, shape index: {}]  }
   0x1   :  { %11 = vsyncpa [#allocation6], 0 }
   0x2   :  { %12 = vsyncpa [#allocation4], 0  ;;  %s1089_s18 = smov [#allocation5]   ;;  %s995_s22 = scalar_lea.hbm %s1187_s1, 2048 }
   0x3   :  { %s30_s19 = sshll.u32 %s1089_s18, 4  ;;  %p996_p0 = scmp.ne.s32.totalorder %s1187_s1, %s995_s22  ;;  %s31_s19 = int_to_ptr.vmem [resolvable:$true] %s30_s19 }
   0x4   :  { %p999_p1 = scmp.lt.u32.totalorder %s995_s22, %s1187_s1 }
   0x6   :  { %p1001_p2 = pnand %p999_p1, %p996_p0 }
   0x8   :  { %1004 = shalt.err (!%p1001_p2)
}
   0x9   :  { %s1005_s27 = scalar_lea.vmem %s31_s19, 2048  ;;  %p1010_p4 = scmp.lt.s32.totalorder %s31_s19, %s31_s19 }
   0xa   :  { %p1006_p3 = scmp.ne.s32.totalorder %s31_s19, %s1005_s27  ;;  %p1011_p5 = scmp.lt.s32.totalorder %s1005_s27, %s1005_s27 }
   0xc   :  { %p1012_p6 = por %p1011_p5, %p1010_p4 }
   0xe   :  { %p1013_p7 = pnand %p1012_p6, %p1006_p3 }
  0x10   :  { %1016 = shalt.err (!%p1013_p7)
}
  0x11   :  { %s1090_s28 = smov 128   ;;  %s1091_s29 = smov 8  }
  0x12   :  { %36 = dma.hbm_to_vmem [thread:$0]  %s1187_s1, 2048, %s31_s19, [#allocation6], %s1090_s28, %s1090_s28, %s1091_s29  }
  0x13   :  { %s1092_s7 = smov [#allocation2]   ;;  %s1017_s11 = scalar_lea.hbm %s1186_s0, 128 }
  0x14   :  { %s18_s8 = sshll.u32 %s1092_s7, 4  ;;  %p1018_p8 = scmp.ne.s32.totalorder %s1186_s0, %s1017_s11  ;;  %s19_s8 = int_to_ptr.vmem [resolvable:$true] %s18_s8 }
  0x15   :  { %p1021_p9 = scmp.lt.u32.totalorder %s1017_s11, %s1186_s0 }
  0x17   :  { %p1023_p10 = pnand %p1021_p9, %p1018_p8 }
  0x19   :  { %1026 = shalt.err (!%p1023_p10)
}
  0x1a   :  { %s1027_s16 = scalar_lea.vmem %s19_s8, 128  ;;  %p1032_p12 = scmp.lt.s32.totalorder %s19_s8, %s19_s8 }
  0x1b   :  { %p1028_p11 = scmp.ne.s32.totalorder %s19_s8, %s1027_s16  ;;  %p1033_p13 = scmp.lt.s32.totalorder %s1027_s16, %s1027_s16 }
  0x1d   :  { %p1034_p0 = por %p1033_p13, %p1032_p12 }
  0x1f   :  { %p1035_p1 = pnand %p1034_p0, %p1028_p11 }
  0x21   :  { %1038 = shalt.err (!%p1035_p1)
}
  0x22   :  { %s1093_s1 = smov 64   ;;  %s1094_s17 = smov 4  }
  0x23   :  { %24 = dma.hbm_to_vmem [thread:$0]  %s1186_s0, 128, %s19_s8, [#allocation3], %s1093_s1, %s1093_s1, %s1094_s17  }
  0x24   :  { %s1095_s20 = smov [#allocation7]   ;;  %s1039_s24 = scalar_lea.hbm %s1189_s3, 8192 }
  0x25   :  { %s44_s21 = sshll.u32 %s1095_s20, 4  ;;  %p1040_p2 = scmp.ne.s32.totalorder %s1189_s3, %s1039_s24  ;;  %s45_s21 = int_to_ptr.vmem [resolvable:$true] %s44_s21 }
  0x26   :  { %p1043_p3 = scmp.lt.u32.totalorder %s1039_s24, %s1189_s3 }
  0x28   :  { %p1045_p4 = pnand %p1043_p3, %p1040_p2 }
  0x2a   :  { %1048 = shalt.err (!%p1045_p4)
}
  0x2b   :  { %s1049_s29 = scalar_lea.vmem %s45_s21, 8192  ;;  %p1054_p6 = scmp.lt.s32.totalorder %s45_s21, %s45_s21 }
  0x2c   :  { %p1050_p5 = scmp.ne.s32.totalorder %s45_s21, %s1049_s29  ;;  %p1055_p7 = scmp.lt.s32.totalorder %s1049_s29, %s1049_s29 }
  0x2e   :  { %p1056_p8 = por %p1055_p7, %p1054_p6 }
  0x30   :  { %p1057_p9 = pnand %p1056_p8, %p1050_p5 }
  0x32   :  { %1060 = shalt.err (!%p1057_p9)
}
  0x33   :  { %s1096_s0 = smov 256   ;;  %s1097_s30 = smov 16  }
  0x34   :  { %50 = dma.hbm_to_vmem [thread:$0]  %s1189_s3, 8192, %s45_s21, [#allocation6], %s1096_s0, %s1096_s0, %s1097_s30  }
  0x35   :  { %1083 = dma.done.wait [#allocation3], 128  }
  0x36   :  { %1084 = vsyncadd [#allocation3], 4294967168 }
  0x37   :  { %1085 = dma.done.wait [#allocation6], 10240  }
  0x38   :  { %1086 = vsyncadd [#allocation6], 4294957056  ;;  %v1098_v0 = vmov 0   ;;  %v870_v1 = vld [vmem:[#allocation5 + $0x4] ss:$8 sps:$4 sm:$0xff]   ;;  %v894_v29 = vld [vmem:[#allocation2] sm:$0xff]  }
  0x39   :  { %211 = vmatprep.mubr.bf16.mxu0 %v1098_v0  ;;  %v872_v2 = vld [vmem:[#allocation5] ss:$8 sps:$4 sm:$0xff]   ;;  %179 = vmatprep.subr.bf16.mxu0 %v870_v1  ;;  %v873_v3 = vld [vmem:[#allocation5 + $0x14] ss:$8 sps:$4 sm:$0xff]   ;;  %v875_v4 = vld [vmem:[#allocation5 + $0x10] ss:$8 sps:$4 sm:$0xff]  }
  0x3a   :  { %180 = vmatpush1.bf16.msra.mxu0 %v872_v2  ;;  %v876_v5 = vld [vmem:[#allocation5 + $0x24] ss:$8 sps:$4 sm:$0xff]   ;;  %v878_v6 = vld [vmem:[#allocation5 + $0x20] ss:$8 sps:$4 sm:$0xff]   ;;  %v879_v7 = vld [vmem:[#allocation5 + $0x34] ss:$8 sps:$4 sm:$0xff]  }
  0x3b   :  { %181 = vmatprep.subr.bf16.mxu0 %v873_v3  ;;  %v881_v8 = vld [vmem:[#allocation5 + $0x30] ss:$8 sps:$4 sm:$0xff]   ;;  %v882_v9 = vld [vmem:[#allocation5 + $0x44] ss:$8 sps:$4 sm:$0xff]   ;;  %v884_v11 = vld [vmem:[#allocation5 + $0x40] ss:$8 sps:$4 sm:$0xff]  }
  0x3c   :  { %v895_v10 = vld [vmem:[#allocation7 + $0x4] ss:$16 sps:$4 sm:$0xff]   ;;  %v900_v12 = vld [vmem:[#allocation7] ss:$16 sps:$4 sm:$0xff]   ;;  %v899_v26 = vld [vmem:[#allocation7 + $0xc] ss:$16 sps:$4 sm:$0xff]  }
  0x3d   :  { %634 = vmatprep.subr.bf16.mxu1 %v895_v10  ;;  %v901_v13 = vld [vmem:[#allocation7 + $0x24] ss:$16 sps:$4 sm:$0xff]   ;;  %v906_v15 = vld [vmem:[#allocation7 + $0x20] ss:$16 sps:$4 sm:$0xff]   ;;  %v897_v30 = vld [vmem:[#allocation7 + $0x8] ss:$16 sps:$4 sm:$0xff]  }
  0x3e   :  { %182 = vmatpush1.bf16.msra.mxu0 %v875_v4  ;;  %v885_v14 = vld [vmem:[#allocation5 + $0x54] ss:$8 sps:$4 sm:$0xff]   ;;  %635 = vmatpush1.bf16.msra.mxu1 %v900_v12  ;;  %v887_v17 = vld [vmem:[#allocation5 + $0x50] ss:$8 sps:$4 sm:$0xff]   ;;  %v888_v18 = vld [vmem:[#allocation5 + $0x64] ss:$8 sps:$4 sm:$0xff]  }
  0x3f   :  { %183 = vmatprep.subr.bf16.mxu0 %v876_v5  ;;  %636 = vmatprep.subr.bf16.mxu1 %v901_v13  ;;  %v907_v16 = vld [vmem:[#allocation7 + $0x44] ss:$16 sps:$4 sm:$0xff]   ;;  %v912_v19 = vld [vmem:[#allocation7 + $0x40] ss:$16 sps:$4 sm:$0xff]   ;;  %v905_v31 = vld [vmem:[#allocation7 + $0x2c] ss:$16 sps:$4 sm:$0xff]  }
  0x40   :  { %v913_v20 = vld [vmem:[#allocation7 + $0x64] ss:$16 sps:$4 sm:$0xff]   ;;  %v890_v21 = vld [vmem:[#allocation5 + $0x60] ss:$8 sps:$4 sm:$0xff]   ;;  %v893_v25 = vld [vmem:[#allocation5 + $0x70] ss:$8 sps:$4 sm:$0xff]  }
  0x41   :  { %v891_v22 = vld [vmem:[#allocation5 + $0x74] ss:$8 sps:$4 sm:$0xff]   ;;  %v918_v23 = vld [vmem:[#allocation7 + $0x60] ss:$16 sps:$4 sm:$0xff]   ;;  %v903_v34 = vld [vmem:[#allocation7 + $0x28] ss:$16 sps:$4 sm:$0xff]  }
  0x42   :  { %184 = vmatpush1.bf16.msra.mxu0 %v878_v6  ;;  %637 = vmatpush1.bf16.msra.mxu1 %v906_v15  ;;  %v919_v24 = vld [vmem:[#allocation7 + $0x84] ss:$16 sps:$4 sm:$0xff]   ;;  %v924_v27 = vld [vmem:[#allocation7 + $0x80] ss:$16 sps:$4 sm:$0xff]   ;;  %v911_v35 = vld [vmem:[#allocation7 + $0x4c] ss:$16 sps:$4 sm:$0xff]  }
  0x43   :  { %185 = vmatprep.subr.bf16.mxu0 %v879_v7  ;;  %638 = vmatprep.subr.bf16.mxu1 %v907_v16  ;;  %v925_v28 = vld [vmem:[#allocation7 + $0xa4] ss:$16 sps:$4 sm:$0xff]   ;;  %v930_v32 = vld [vmem:[#allocation7 + $0xa0] ss:$16 sps:$4 sm:$0xff]   ;;  %v909_v38 = vld [vmem:[#allocation7 + $0x48] ss:$16 sps:$4 sm:$0xff]  }
  0x44   :  { %v931_v33 = vld [vmem:[#allocation7 + $0xc4] ss:$16 sps:$4 sm:$0xff]   ;;  %v936_v36 = vld [vmem:[#allocation7 + $0xc0] ss:$16 sps:$4 sm:$0xff]   ;;  %v917_v39 = vld [vmem:[#allocation7 + $0x6c] ss:$16 sps:$4 sm:$0xff]  }
  0x45   :  { %v937_v37 = vld [vmem:[#allocation7 + $0xe4] ss:$16 sps:$4 sm:$0xff]   ;;  %v942_v40 = vld [vmem:[#allocation7 + $0xe0] ss:$16 sps:$4 sm:$0xff]   ;;  %v915_v42 = vld [vmem:[#allocation7 + $0x68] ss:$16 sps:$4 sm:$0xff]  }
  0x46   :  { %186 = vmatpush1.bf16.msra.mxu0 %v881_v8  ;;  %639 = vmatpush1.bf16.msra.mxu1 %v912_v19  ;;  %v943_v41 = vld [vmem:[#allocation7 + $0x104] ss:$16 sps:$4 sm:$0xff]   ;;  %v923_v43 = vld [vmem:[#allocation7 + $0x8c] ss:$16 sps:$4 sm:$0xff]   ;;  %v948_v44 = vld [vmem:[#allocation7 + $0x100] ss:$16 sps:$4 sm:$0xff]  }
  0x47   :  { %187 = vmatprep.subr.bf16.mxu0 %v882_v9  ;;  %640 = vmatprep.subr.bf16.mxu1 %v913_v20  ;;  %v949_v45 = vld [vmem:[#allocation7 + $0x124] ss:$16 sps:$4 sm:$0xff]   ;;  %v921_v46 = vld [vmem:[#allocation7 + $0x88] ss:$16 sps:$4 sm:$0xff]   ;;  %v929_v47 = vld [vmem:[#allocation7 + $0xac] ss:$16 sps:$4 sm:$0xff]  }
  0x48   :  { %v954_v48 = vld [vmem:[#allocation7 + $0x120] ss:$16 sps:$4 sm:$0xff]   ;;  %v955_v49 = vld [vmem:[#allocation7 + $0x144] ss:$16 sps:$4 sm:$0xff]   ;;  %v927_v50 = vld [vmem:[#allocation7 + $0xa8] ss:$16 sps:$4 sm:$0xff]  }
  0x49   :  { %v935_v51 = vld [vmem:[#allocation7 + $0xcc] ss:$16 sps:$4 sm:$0xff]   ;;  %v960_v52 = vld [vmem:[#allocation7 + $0x140] ss:$16 sps:$4 sm:$0xff]   ;;  %v961_v53 = vld [vmem:[#allocation7 + $0x164] ss:$16 sps:$4 sm:$0xff]  }
  0x4a   :  { %188 = vmatpush1.bf16.msra.mxu0 %v884_v11  ;;  %641 = vmatpush1.bf16.msra.mxu1 %v918_v23  ;;  %v933_v54 = vld [vmem:[#allocation7 + $0xc8] ss:$16 sps:$4 sm:$0xff]   ;;  %v941_v55 = vld [vmem:[#allocation7 + $0xec] ss:$16 sps:$4 sm:$0xff]   ;;  %v966_v56 = vld [vmem:[#allocation7 + $0x160] ss:$16 sps:$4 sm:$0xff]  }
  0x4b   :  { %189 = vmatprep.subr.bf16.mxu0 %v885_v14  ;;  %642 = vmatprep.subr.bf16.mxu1 %v919_v24  ;;  %v967_v57 = vld [vmem:[#allocation7 + $0x184] ss:$16 sps:$4 sm:$0xff]   ;;  %v939_v58 = vld [vmem:[#allocation7 + $0xe8] ss:$16 sps:$4 sm:$0xff]   ;;  %v947_v59 = vld [vmem:[#allocation7 + $0x10c] ss:$16 sps:$4 sm:$0xff]  }
  0x4c   :  { %v972_v60 = vld [vmem:[#allocation7 + $0x180] ss:$16 sps:$4 sm:$0xff]   ;;  %v973_v61 = vld [vmem:[#allocation7 + $0x1a4] ss:$16 sps:$4 sm:$0xff]   ;;  %v945_v62 = vld [vmem:[#allocation7 + $0x108] ss:$16 sps:$4 sm:$0xff]  }
  0x4d   :  { %v953_v63 = vld [vmem:[#allocation7 + $0x12c] ss:$16 sps:$4 sm:$0xff]   ;;  %v951_v0 = vld [vmem:[#allocation7 + $0x128] ss:$16 sps:$4 sm:$0xff]   ;;  %v978_v9 = vld [vmem:[#allocation7 + $0x1a0] ss:$16 sps:$4 sm:$0xff]  }
  0x4e   :  { %190 = vmatpush1.bf16.msra.mxu0 %v887_v17  ;;  %643 = vmatpush1.bf16.msra.mxu1 %v924_v27  ;;  %v959_v1 = vld [vmem:[#allocation7 + $0x14c] ss:$16 sps:$4 sm:$0xff]   ;;  %v957_v2 = vld [vmem:[#allocation7 + $0x148] ss:$16 sps:$4 sm:$0xff]   ;;  %v979_v10 = vld [vmem:[#allocation7 + $0x1c4] ss:$16 sps:$4 sm:$0xff]  }
  0x4f   :  { %191 = vmatprep.subr.bf16.mxu0 %v888_v18  ;;  %644 = vmatprep.subr.bf16.mxu1 %v925_v28  ;;  %v965_v3 = vld [vmem:[#allocation7 + $0x16c] ss:$16 sps:$4 sm:$0xff]   ;;  %v963_v4 = vld [vmem:[#allocation7 + $0x168] ss:$16 sps:$4 sm:$0xff]   ;;  %v984_v13 = vld [vmem:[#allocation7 + $0x1c0] ss:$16 sps:$4 sm:$0xff]   ;;  %v83_v18 = vlaneseq }
  0x50   :  { %v971_v5 = vld [vmem:[#allocation7 + $0x18c] ss:$16 sps:$4 sm:$0xff]   ;;  %v969_v6 = vld [vmem:[#allocation7 + $0x188] ss:$16 sps:$4 sm:$0xff]   ;;  %v985_v14 = vld [vmem:[#allocation7 + $0x1e4] ss:$16 sps:$4 sm:$0xff]  }
  0x51   :  { %v977_v7 = vld [vmem:[#allocation7 + $0x1ac] ss:$16 sps:$4 sm:$0xff]   ;;  %v975_v8 = vld [vmem:[#allocation7 + $0x1a8] ss:$16 sps:$4 sm:$0xff]   ;;  %v990_v17 = vld [vmem:[#allocation7 + $0x1e0] ss:$16 sps:$4 sm:$0xff]  }
  0x52   :  { %192 = vmatpush1.bf16.msra.mxu0 %v890_v21  ;;  %645 = vmatpush1.bf16.msra.mxu1 %v930_v32  ;;  %v983_v11 = vld [vmem:[#allocation7 + $0x1cc] ss:$16 sps:$4 sm:$0xff]   ;;  %v981_v12 = vld [vmem:[#allocation7 + $0x1c8] ss:$16 sps:$4 sm:$0xff]   ;;  %v84_v19 = vshrl.u32 %v83_v18, 7 }
  0x53   :  { %193 = vmatprep.subr.bf16.mxu0 %v891_v22  ;;  %646 = vmatprep.subr.bf16.mxu1 %v931_v33  ;;  %v989_v15 = vld [vmem:[#allocation7 + $0x1ec] ss:$16 sps:$4 sm:$0xff]   ;;  %v987_v16 = vld [vmem:[#allocation7 + $0x1e8] ss:$16 sps:$4 sm:$0xff]  }
  0x54   :  { %v85_v20 = vsub.s32 0, %v84_v19  ;;  %v81_v21 = vld [vmem:[%s1188_s2] sm:$0x3]  ;;  %v89_v22 = vsub.s32 1, %v84_v19 }
  0x56   :  { %194 = vmatpush1.bf16.msra.mxu0 %v893_v25  ;;  %647 = vmatpush1.bf16.msra.mxu1 %v936_v36  ;;  %v86_v23 = vrot.slane %v81_v21, %v85_v20  ;;  %v90_v24 = vrot.slane %v81_v21, %v89_v22 }
  0x57   :  { %677 = vmatprep.subr.bf16.mxu0 %v899_v26  ;;  %648 = vmatprep.subr.bf16.mxu1 %v937_v37 }
  0x59   :  { %212 = vmatmul.mubr.bf16.vlgmr.msra.gmra.mrb[0].mxu0 %v894_v29 }
  0x5a   :  { %678 = vmatpush1.bf16.msra.mxu0 %v897_v30  ;;  %649 = vmatpush1.bf16.msra.mxu1 %v942_v40  ;;  %v304_v40 = vsub.s32 2, %v84_v19 }
  0x5b   :  { %679 = vmatprep.subr.bf16.mxu0 %v905_v31  ;;  %650 = vmatprep.subr.bf16.mxu1 %v943_v41  ;;  %v308_v41 = vsub.s32 3, %v84_v19 }
  0x5e   :  { %680 = vmatpush1.bf16.msra.mxu0 %v903_v34  ;;  %651 = vmatpush1.bf16.msra.mxu1 %v948_v44 }
  0x5f   :  { %681 = vmatprep.subr.bf16.mxu0 %v911_v35  ;;  %652 = vmatprep.subr.bf16.mxu1 %v949_v45 }
  0x62   :  { %682 = vmatpush1.bf16.msra.mxu0 %v909_v38  ;;  %653 = vmatpush1.bf16.msra.mxu1 %v954_v48 }
  0x63   :  { %683 = vmatprep.subr.bf16.mxu0 %v917_v39  ;;  %654 = vmatprep.subr.bf16.mxu1 %v955_v49  ;;  %v292_v39 = vld [vmem:[%s1190_s4] sm:$0xf]  ;;  %s1099_s4 = smov [#allocation8]  }
  0x64   :  { %v301_v44 = vrot.slane %v292_v39, %v89_v22  ;;  %s763_s10 = sshll.u32 %s1099_s4, 4  ;;  %s764_s10 = int_to_ptr.vmem [resolvable:$true] %s763_s10 }
  0x65   :  { %s1061_s11 = scalar_lea.vmem %s764_s10, 1024  ;;  %p1066_p11 = scmp.lt.s32.totalorder %s764_s10, %s764_s10 }
  0x66   :  { %684 = vmatpush1.bf16.msra.mxu0 %v915_v42  ;;  %655 = vmatpush1.bf16.msra.mxu1 %v960_v52  ;;  %v297_v42 = vrot.slane %v292_v39, %v85_v20  ;;  %p1062_p10 = scmp.ne.s32.totalorder %s764_s10, %s1061_s11  ;;  %p1067_p12 = scmp.lt.s32.totalorder %s1061_s11, %s1061_s11 }
  0x67   :  { %685 = vmatprep.subr.bf16.mxu0 %v923_v43  ;;  %656 = vmatprep.subr.bf16.mxu1 %v961_v53  ;;  %v305_v43 = vrot.slane %v292_v39, %v304_v40 }
  0x68   :  { %p1068_p13 = por %p1067_p12, %p1066_p11 }
  0x6a   :  { %686 = vmatpush1.bf16.msra.mxu0 %v921_v46  ;;  %657 = vmatpush1.bf16.msra.mxu1 %v966_v56  ;;  %p1069_p0 = pnand %p1068_p13, %p1062_p10 }
  0x6b   :  { %687 = vmatprep.subr.bf16.mxu0 %v929_v47  ;;  %658 = vmatprep.subr.bf16.mxu1 %v967_v57  ;;  %v309_v47 = vrot.slane %v292_v39, %v308_v41 }
  0x6e   :  { %688 = vmatpush1.bf16.msra.mxu0 %v927_v50  ;;  %659 = vmatpush1.bf16.msra.mxu1 %v972_v60 }
  0x6f   :  { %689 = vmatprep.subr.bf16.mxu0 %v935_v51  ;;  %660 = vmatprep.subr.bf16.mxu1 %v973_v61 }
  0x72   :  { %690 = vmatpush1.bf16.msra.mxu0 %v933_v54  ;;  %661 = vmatpush1.bf16.msra.mxu1 %v978_v9 }
  0x73   :  { %691 = vmatprep.subr.bf16.mxu0 %v941_v55  ;;  %662 = vmatprep.subr.bf16.mxu1 %v979_v10 }
  0x76   :  { %692 = vmatpush1.bf16.msra.mxu0 %v939_v58  ;;  %663 = vmatpush1.bf16.msra.mxu1 %v984_v13 }
  0x77   :  { %693 = vmatprep.subr.bf16.mxu0 %v947_v59  ;;  %664 = vmatprep.subr.bf16.mxu1 %v985_v14 }
  0x7a   :  { %694 = vmatpush1.bf16.msra.mxu0 %v945_v62  ;;  %665 = vmatpush1.bf16.msra.mxu1 %v990_v17 }
  0x7b   :  { %695 = vmatprep.subr.bf16.mxu0 %v953_v63 }
  0x7e   :  { %696 = vmatpush1.bf16.msra.mxu0 %v951_v0 }
  0x7f   :  { %697 = vmatprep.subr.bf16.mxu0 %v959_v1 }
  0x82   :  { %698 = vmatpush1.bf16.msra.mxu0 %v957_v2 }
  0x83   :  { %699 = vmatprep.subr.bf16.mxu0 %v965_v3 }
  0x86   :  { %700 = vmatpush1.bf16.msra.mxu0 %v963_v4 }
  0x87   :  { %701 = vmatprep.subr.bf16.mxu0 %v971_v5 }
  0x8a   :  { %702 = vmatpush1.bf16.msra.mxu0 %v969_v6 }
  0x8b   :  { %703 = vmatprep.subr.bf16.mxu0 %v977_v7 }
  0x8e   :  { %704 = vmatpush1.bf16.msra.mxu0 %v975_v8 }
  0x8f   :  { %705 = vmatprep.subr.bf16.mxu0 %v983_v11 }
  0x92   :  { %706 = vmatpush1.bf16.msra.mxu0 %v981_v12 }
  0x93   :  { %707 = vmatprep.subr.bf16.mxu0 %v989_v15 }
  0x96   :  { %708 = vmatpush1.bf16.msra.mxu0 %v987_v16 }
 0x12c   :  { %v213_v25 = vpop.f32.mrb[0].mxu0 }
 0x12d   :  { %v214_v26 = vadd.f32 %v213_v25, %v86_v23  ;;  %v215_v27 = vpop.f32.mrb[1].mxu0 }
 0x12e   :  { %v216_v28 = vadd.f32 %v215_v27, %v90_v24  ;;  %v217_v29 = vpop.f32.mrb[2].mxu0 }
 0x12f   :  { %v218_v30 = vadd.f32 %v217_v29, %v86_v23  ;;  %v219_v31 = vpop.f32.mrb[3].mxu0  ;;  %v222_v33 = vmax.f32 %v214_v26, 0.0 }
 0x130   :  { %v220_v32 = vadd.f32 %v219_v31, %v90_v24  ;;  %v223_v35 = vmax.f32 %v216_v28, 0.0 }
 0x131   :  { %v224_v34 = vmax.f32 %v218_v30, 0.0 }
 0x132   :  { %v225_v36 = vmax.f32 %v220_v32, 0.0 }
 0x133   :  { %v226_v37 = vpack.c.bf16 %v224_v34, %v222_v33 }
 0x134   :  { %v227_v38 = vpack.c.bf16 %v225_v36, %v223_v35 }
 0x136   :  { %666 = vmatprep.mubr.bf16.mxu1 %v227_v38  ;;  %709 = vmatprep.mubr.bf16.mxu0 %v227_v38 }
 0x137   :  { %667 = vmatmul.mubr.bf16.vlgmr.msra.gmra.mrb[0].mxu1 %v226_v37  ;;  %710 = vmatmul.mubr.bf16.vlgmr.msra.gmra.mrb[4].mxu0 %v226_v37 }
 0x20a   :  { %v668_v45 = vpop.f32.mrb[0].mxu1  ;;  %v711_v46 = vpop.f32.mrb[4].mxu0 }
 0x20b   :  { %v669_v48 = vadd.f32 %v668_v45, %v297_v42  ;;  %v670_v49 = vpop.f32.mrb[1].mxu1  ;;  %v713_v50 = vpop.f32.mrb[5].mxu0  ;;  %v712_v51 = vadd.f32 %v711_v46, %v305_v43 }
 0x20c   :  { %v671_v52 = vadd.f32 %v670_v49, %v301_v44  ;;  %v672_v53 = vpop.f32.mrb[2].mxu1  ;;  %v715_v54 = vpop.f32.mrb[6].mxu0  ;;  %v714_v60 = vadd.f32 %v713_v50, %v309_v47 }
 0x20d   :  { %v720_v55 = vmul.f32 %v669_v48, %v669_v48  ;;  %v673_v56 = vadd.f32 %v672_v53, %v297_v42  ;;  %v674_v57 = vpop.f32.mrb[3].mxu1  ;;  %v717_v58 = vpop.f32.mrb[7].mxu0  ;;  %v716_v61 = vadd.f32 %v715_v54, %v305_v43  ;;  %v722_v0 = vmul.f32 %v712_v51, %v712_v51 }
 0x20e   :  { %v721_v59 = vmul.f32 %v671_v52, %v671_v52  ;;  %v675_v62 = vadd.f32 %v674_v57, %v301_v44  ;;  %v718_v3 = vadd.f32 %v717_v58, %v309_v47  ;;  %v723_v6 = vmul.f32 %v714_v60, %v714_v60 }
 0x20f   :  { %v724_v63 = vmul.f32 %v673_v56, %v673_v56  ;;  %v726_v4 = vmul.f32 %v716_v61, %v716_v61 }
 0x210   :  { %v725_v1 = vmul.f32 %v675_v62, %v675_v62  ;;  %v728_v2 = vadd.f32 %v721_v59, %v720_v55  ;;  %v727_v10 = vmul.f32 %v718_v3, %v718_v3 }
 0x212   :  { %v733_v5 = vadd.f32 %v725_v1, %v724_v63  ;;  %v729_v7 = vadd.f32 %v728_v2, %v722_v0 }
 0x214   :  { %v730_v8 = vadd.f32 %v729_v7, %v723_v6  ;;  %v734_v9 = vadd.f32 %v733_v5, %v726_v4 }
 0x216   :  { %731 = vadd.xlane.f32.xlu0 %v730_v8  ;;  %v735_v11 = vadd.f32 %v734_v9, %v727_v10 }
 0x21a   :  { %736 = vadd.xlane.f32.xlu0 %v735_v11 }
 0x2a3   :  { %v732_v12 = vpop.xlane.xlu0 %731 }
 0x2a4   :  { %v738_v13 = vadd.f32 1e-12, %v732_v12 }
 0x2a6   :  { %991 = vrsqrt.f32 %v738_v13 }
 0x2a7   :  { %v737_v14 = vpop.xlane.xlu0 %736 }
 0x2a8   :  { %v739_v15 = vadd.f32 1e-12, %v737_v14 }
 0x2aa   :  { %993 = vrsqrt.f32 %v739_v15 }
 0x2b0   :  { %v992_v16 = vpop.eup %991 }
 0x2b1   :  { %v742_v17 = vmul.f32 %v992_v16, %v669_v48  ;;  %v743_v18 = vmul.f32 %v992_v16, %v671_v52  ;;  %v744_v19 = vmul.f32 %v992_v16, %v712_v51  ;;  %v745_v20 = vmul.f32 %v992_v16, %v714_v60 }
 0x2b3   :  { %750 = vst [vmem:[#allocation8] sm:$0xff] %v742_v17  ;;  %751 = vst [vmem:[#allocation8 + $0x8] sm:$0xff] %v743_v18 }
 0x2b4   :  { %752 = vst [vmem:[#allocation8 + $0x10] sm:$0xff] %v744_v19  ;;  %753 = vst [vmem:[#allocation8 + $0x18] sm:$0xff] %v745_v20  ;;  %v994_v21 = vpop.eup %993 }
 0x2b5   :  { %v746_v22 = vmul.f32 %v994_v21, %v673_v56  ;;  %v747_v23 = vmul.f32 %v994_v21, %v675_v62  ;;  %v748_v24 = vmul.f32 %v994_v21, %v716_v61  ;;  %v749_v25 = vmul.f32 %v994_v21, %v718_v3 }
 0x2b7   :  { %754 = vst [vmem:[#allocation8 + $0x20] sm:$0xff] %v746_v22  ;;  %755 = vst [vmem:[#allocation8 + $0x28] sm:$0xff] %v747_v23 }
 0x2b8   :  { %756 = vst [vmem:[#allocation8 + $0x30] sm:$0xff] %v748_v24  ;;  %757 = vst [vmem:[#allocation8 + $0x38] sm:$0xff] %v749_v25 }
 0x2b9   :  { %1072 = shalt.err (!%p1069_p0)
}
 0x2ba   :  { %s1073_s14 = scalar_lea.hbm %s1191_s5, 1024 }
 0x2bb   :  { %p1074_p1 = scmp.ne.s32.totalorder %s1191_s5, %s1073_s14  ;;  %p1077_p2 = scmp.lt.u32.totalorder %s1073_s14, %s1191_s5 }
 0x2bd   :  { %p1079_p3 = pnand %p1077_p2, %p1074_p1 }
 0x2bf   :  { %1082 = shalt.err (!%p1079_p3)
}
 0x2c0   :  { %s1100_s18 = smov 512   ;;  %s1101_s19 = smov 32  }
 0x2c1   :  { %769 = dma.vmem_to_hbm [thread:$0]  %s764_s10, 1024, %s1191_s5, [#allocation4], %s1100_s18, %s1100_s18, %s1101_s19  }
 0x2c2   :  { %1087 = dma.done.wait [#allocation4], 1024  }
 0x2c3   :  { %1088 = vsyncadd [#allocation4], 4294966272 }
 0x2c4   :  { %773 = vsyncpa [#allocation3], 1 }
 0x2c5   :  { %774 = vsyncpa [#allocation6], 1 }
 0x2c6   :  { %775 = vsyncpa [#allocation4], 1 }

</bundles_post_ra>
